<compile_context>
chip_gen: v6e
topology: v6e:2x2x1
jax: 0.10.0
libtpu: 0.0.40
codegen_flags: <defaults>
</compile_context>

<pallas_src>
import jax
import jax.numpy as jnp
from jax.experimental import pallas as pl
from jax.experimental.pallas import tpu as pltpu


_LANE = 128
_SUBLANE = 8
_X_BLOCK_BUDGET_BYTES = 4 * 1024 * 1024   # per single x buffer (x2 for double-buffering)
_VMEM_LIMIT_BYTES = 32 * 1024 * 1024      # safe scoped limit on v5e/v6e (128 MiB) and v7x (64 MiB)


def _round_up(n, q):
    return ((n + q - 1) // q) * q


def _pick_tile(total, quantum, bytes_per_unit, budget_bytes=_X_BLOCK_BUDGET_BYTES):
    """Largest tile along an axis of length `total` (multiple of `quantum`, or the full
    axis) whose per-buffer x-block footprint stays within `budget_bytes`."""
    if total <= quantum or total * bytes_per_unit <= budget_bytes:
        return int(total)
    tile = (budget_bytes // max(bytes_per_unit, 1)) // quantum * quantum
    return int(min(total, max(quantum, tile)))


def _wavg_lane_kernel(x_ref, w_ref, o_ref):
    """Softmax + weighted sum over the LAST (lane) axis.

    x_ref: (1, C, TM, R)   w_ref: (1, 1, TM, R)   o_ref: (1, C, TM)
    """
    w = w_ref[0, 0].astype(jnp.float32)                                   # (TM, R)
    m = jnp.max(w, axis=-1, keepdims=True)
    e = jnp.exp(w - m)
    p = e * pl.reciprocal(jnp.sum(e, axis=-1, keepdims=True), approx=True)
    # Multiply lazily (no standalone f32 copy of the x block), accumulate in f32.
    feat = jnp.sum(x_ref[0].astype(jnp.float32) * p[None], axis=-1)       # (C, TM)
    o_ref[0] = feat.astype(o_ref.dtype)


def _wavg_sublane_kernel(x_ref, w_ref, o_ref):
    """Softmax + weighted sum over the SECOND-TO-LAST (sublane) axis.  Rank-generic:

      'yz': x_ref (1, C, R, TM),    w_ref (1, 1, R, TM),    o_ref (1, C, TM)
      'zx': x_ref (1, C, TH, R, Z), w_ref (1, 1, TH, R, Z), o_ref (1, C, TH, Z)
    """
    w = w_ref[0, 0].astype(jnp.float32)                                   # (..., R, M)
    m = jnp.max(w, axis=-2, keepdims=True)
    e = jnp.exp(w - m)
    p = e * pl.reciprocal(jnp.sum(e, axis=-2, keepdims=True), approx=True)
    feat = jnp.sum(x_ref[0].astype(jnp.float32) * p[None], axis=-2)       # (C, ..., M)
    o_ref[0] = feat.astype(o_ref.dtype)


def _compiler_params():
    return pltpu.CompilerParams(
        dimension_semantics=("parallel", "parallel"),
        vmem_limit_bytes=_VMEM_LIMIT_BYTES,
    )


@jax.jit
def _pool_xy(x, weights):
    # Reduce Z (already the lane axis); tile M = H*W on sublanes; output lanes = TM (dense).
    B, C, H, W, Z = x.shape
    M = H * W
    itemsize = jnp.dtype(x.dtype).itemsize
    bytes_per_m = C * _round_up(Z, _LANE) * itemsize        # Z pads to 128 lanes in VMEM
    TM = _pick_tile(M, _LANE, bytes_per_m)
    x_c = x.reshape(B, C, M, Z)                             # contiguous view (free)
    w_c = weights.reshape(B, 3, M, Z)                       # contiguous view (free)
    out = pl.pallas_call(
        _wavg_lane_kernel,
        out_shape=jax.ShapeDtypeStruct((B, C, M), x.dtype),
        grid_spec=pltpu.PrefetchScalarGridSpec(
            num_scalar_prefetch=0,
            grid=(B, pl.cdiv(M, TM)),
            in_specs=[
                pl.BlockSpec((1, C, TM, Z), lambda b, m: (b, 0, m, 0)),
                pl.BlockSpec((1, 1, TM, Z), lambda b, m: (b, 0, m, 0)),   # weights channel 0
            ],
            out_specs=pl.BlockSpec((1, C, TM), lambda b, m: (b, 0, m)),
        ),
        compiler_params=_compiler_params(),
    )(x_c, w_c)
    return out.reshape(B, C, H, W)


@jax.jit
def _pool_yz(x, weights):
    # Reduce H (sublane axis of the (C, H, W*Z) view); lanes = W*Z (dense); no transpose.
    B, C, H, W, Z = x.shape
    M = W * Z
    itemsize = jnp.dtype(x.dtype).itemsize
    bytes_per_m = C * _round_up(H, _SUBLANE) * itemsize
    TM = _pick_tile(M, _LANE, bytes_per_m)
    x_c = x.reshape(B, C, H, M)                             # contiguous view (free)
    w_c = weights.reshape(B, 3, H, M)                       # contiguous view (free)
    out = pl.pallas_call(
        _wavg_sublane_kernel,
        out_shape=jax.ShapeDtypeStruct((B, C, M), x.dtype),
        grid_spec=pltpu.PrefetchScalarGridSpec(
            num_scalar_prefetch=0,
            grid=(B, pl.cdiv(M, TM)),
            in_specs=[
                pl.BlockSpec((1, C, H, TM), lambda b, m: (b, 0, 0, m)),
                pl.BlockSpec((1, 1, H, TM), lambda b, m: (b, 1, 0, m)),   # weights channel 1
            ],
            out_specs=pl.BlockSpec((1, C, TM), lambda b, m: (b, 0, m)),
        ),
        compiler_params=_compiler_params(),
    )(x_c, w_c)
    return out.reshape(B, C, W, Z)


@jax.jit
def _pool_zx(x, weights):
    # Reduce W (sublane axis of the native (..., W, Z) layout); tile H; no transpose.
    # Output last dim is Z (< 128 lanes -> masked stores), but the output is 1/W of the
    # input traffic, so this beats paying an extra HBM transpose pass on x.
    B, C, H, W, Z = x.shape
    itemsize = jnp.dtype(x.dtype).itemsize
    bytes_per_h = C * _round_up(W, _SUBLANE) * _round_up(Z, _LANE) * itemsize
    TH = _pick_tile(H, _SUBLANE, bytes_per_h)
    out = pl.pallas_call(
        _wavg_sublane_kernel,
        out_shape=jax.ShapeDtypeStruct((B, C, H, Z), x.dtype),
        grid_spec=pltpu.PrefetchScalarGridSpec(
            num_scalar_prefetch=0,
            grid=(B, pl.cdiv(H, TH)),
            in_specs=[
                pl.BlockSpec((1, C, TH, W, Z), lambda b, h: (b, 0, h, 0, 0)),
                pl.BlockSpec((1, 1, TH, W, Z), lambda b, h: (b, 2, h, 0, 0)),  # weights channel 2
            ],
            out_specs=pl.BlockSpec((1, C, TH, Z), lambda b, h: (b, 0, h, 0)),
        ),
        compiler_params=_compiler_params(),
    )(x, weights)
    return out


class WeightedAvgPool3D:
    """JAX/Pallas port of the PyTorch WeightedAvgPool3D module (forward only)."""

    def __init__(self, dim):
        assert dim in ("xy", "yz", "zx")
        self.dim = dim

    def __call__(self, x, weights):
        if self.dim == "xy":
            return _pool_xy(x, weights)
        elif self.dim == "yz":
            return _pool_yz(x, weights)
        else:
            return _pool_zx(x, weights)


def _reference(x, weights, dim):
    if dim == "xy":
        p = jax.nn.softmax(weights[:, 0:1], axis=-1)
        return jnp.sum(x * p, axis=-1)
    elif dim == "yz":
        p = jax.nn.softmax(weights[:, 1:2], axis=-3)
        return jnp.sum(x * p, axis=-3)
    else:
        p = jax.nn.softmax(weights[:, 2:3], axis=-2)
        return jnp.sum(x * p, axis=-2)


if __name__ == "__main__":
    key = jax.random.PRNGKey(0)
    kx, kw = jax.random.split(key)
    B, C, H, W, Z = 2, 4, 8, 8, 8
    x = jax.random.normal(kx, (B, C, H, W, Z), dtype=jnp.float32)
    weights = jax.random.normal(kw, (B, 3, H, W, Z), dtype=jnp.float32)

    ok = True
    for dim in ("xy", "yz", "zx"):
        mod = WeightedAvgPool3D(dim)
        out = jax.block_until_ready(mod(x, weights))
        ref = _reference(x, weights, dim)
        # Tolerance is looser than exact f32 because the softmax denominator uses the EUP
        # approximate reciprocal (pl.reciprocal(..., approx=True)); genuine bugs (wrong
        # reduction axis / wrong weight channel) produce O(1e-1) errors and are still caught.
        if out.shape != ref.shape:
            ok = False
            print(f"SHAPE MISMATCH for dim={dim}: {out.shape} vs {ref.shape}")
        elif not jnp.allclose(out, ref, atol=2e-3, rtol=2e-3):
            ok = False
            err = float(jnp.max(jnp.abs(out - ref)))
            print(f"MISMATCH for dim={dim}: max_abs_err={err}")
    if ok:
        print("KERNEL_OK")
</pallas_src>

<mosaic_0001>
module attributes {stable_mosaic.version = 11 : i64} {
  func.func @_wavg_lane_kernel(%arg0: i32, %arg1: i32, %arg2: memref<1x4x64x8xf32, #tpu.memory_space<vmem>>, %arg3: memref<1x1x64x8xf32, #tpu.memory_space<vmem>>, %arg4: memref<1x4x64xf32, #tpu.memory_space<vmem>>) attributes {dimension_semantics = [#tpu.dimension_semantics<parallel>, #tpu.dimension_semantics<parallel>], iteration_bounds = array<i64: 2, 1>, scalar_prefetch = 0 : i64, scratch_operands = 0 : i64, tpu.core_type = #tpu.core_type<tc>, window_params = [{transform_indices = @transform_0, window_bounds = array<i64: 1, 4, 64, 8>}, {transform_indices = @transform_1, window_bounds = array<i64: 1, 1, 64, 8>}, {transform_indices = @transform_2, window_bounds = array<i64: 1, 4, 64>}]} {
    %c0 = arith.constant 0 : index
    %c0_0 = arith.constant 0 : index
    %c0_1 = arith.constant 0 : index
    %c0_2 = arith.constant 0 : index
    %0 = vector.load %arg3[%c0, %c0_0, %c0_1, %c0_2] : memref<1x1x64x8xf32, #tpu.memory_space<vmem>>, vector<1x1x64x8xf32>
    %1 = vector.shape_cast %0 : vector<1x1x64x8xf32> to vector<64x8xf32>
    %cst = arith.constant dense<0xFF800000> : vector<64xf32>
    %2 = vector.multi_reduction <maximumf>, %1, %cst [1] : vector<64x8xf32> to vector<64xf32>
    %3 = vector.shape_cast %2 : vector<64xf32> to vector<64x1xf32>
    %4 = vector.broadcast %3 : vector<64x1xf32> to vector<64x8xf32>
    %5 = arith.subf %1, %4 : vector<64x8xf32>
    %6 = math.exp %5 : vector<64x8xf32>
    %cst_3 = arith.constant dense<0.000000e+00> : vector<64xf32>
    %7 = vector.multi_reduction <add>, %6, %cst_3 [1] : vector<64x8xf32> to vector<64xf32>
    %8 = vector.shape_cast %7 : vector<64xf32> to vector<64x1xf32>
    %9 = tpu.reciprocal %8 {approx = true} : vector<64x1xf32> -> vector<64x1xf32>
    %10 = vector.broadcast %9 : vector<64x1xf32> to vector<64x8xf32>
    %11 = arith.mulf %6, %10 : vector<64x8xf32>
    %c0_4 = arith.constant 0 : index
    %c0_5 = arith.constant 0 : index
    %c0_6 = arith.constant 0 : index
    %c0_7 = arith.constant 0 : index
    %12 = vector.load %arg2[%c0_4, %c0_5, %c0_6, %c0_7] : memref<1x4x64x8xf32, #tpu.memory_space<vmem>>, vector<1x4x64x8xf32>
    %13 = vector.shape_cast %12 : vector<1x4x64x8xf32> to vector<4x64x8xf32>
    %14 = vector.shape_cast %11 : vector<64x8xf32> to vector<1x64x8xf32>
    %15 = vector.broadcast %14 : vector<1x64x8xf32> to vector<4x64x8xf32>
    %16 = arith.mulf %13, %15 : vector<4x64x8xf32>
    %cst_8 = arith.constant dense<0.000000e+00> : vector<4x64xf32>
    %17 = vector.multi_reduction <add>, %16, %cst_8 [2] : vector<4x64x8xf32> to vector<4x64xf32>
    %c0_9 = arith.constant 0 : index
    %c0_10 = arith.constant 0 : index
    %c0_11 = arith.constant 0 : index
    %18 = vector.load %arg4[%c0_9, %c0_10, %c0_11] : memref<1x4x64xf32, #tpu.memory_space<vmem>>, vector<1x4x64xf32>
    %19 = vector.shape_cast %18 : vector<1x4x64xf32> to vector<4x64xf32>
    %20 = vector.shape_cast %17 : vector<4x64xf32> to vector<1x4x64xf32>
    tpu.vector_store %arg4[%c0_9, %c0_10, %c0_11], %20 {strides = array<i32>} : memref<1x4x64xf32, #tpu.memory_space<vmem>>, vector<1x4x64xf32>,
    return
  }
  func.func @transform_0(%arg0: i32, %arg1: i32) -> (i32, i32, i32, i32) {
    %c0_i32 = arith.constant 0 : i32
    %c0_i32_0 = arith.constant 0 : i32
    %c0_i32_1 = arith.constant 0 : i32
    return %arg0, %c0_i32, %arg1, %c0_i32_0 : i32, i32, i32, i32
  }
  func.func @transform_1(%arg0: i32, %arg1: i32) -> (i32, i32, i32, i32) {
    %c0_i32 = arith.constant 0 : i32
    %c0_i32_0 = arith.constant 0 : i32
    %c0_i32_1 = arith.constant 0 : i32
    return %arg0, %c0_i32, %arg1, %c0_i32_0 : i32, i32, i32, i32
  }
  func.func @transform_2(%arg0: i32, %arg1: i32) -> (i32, i32, i32) {
    %c0_i32 = arith.constant 0 : i32
    %c0_i32_0 = arith.constant 0 : i32
    return %arg0, %c0_i32, %arg1 : i32, i32, i32
  }
}

</mosaic_0001>

<bundles_post_ra>
// kernel: _pool_xy.1
= control target key start
LH: loop header
LB: loop body
LE: loop exit
PB: predicated region body
PF: predicated region fallthrough
CT: control target
= control target key end

     0   :  { %7 = vsyncpa [#allocation3], 0  ;;  %s1423_s0 = inlined_call_operand.hbm [shape: f32[2,4,64,8], index: 0, kind: input, shape index: {}]   ;;  %s1424_s1 = inlined_call_operand.hbm [shape: f32[2,3,64,8], index: 1, kind: input, shape index: {}]   ;;  %s1425_s2 = inlined_call_operand.vmem [shape: f32[2,4,64], index: 2, kind: output, shape index: {}]  }
   0x1   :  { %9 = vsyncpa [#allocation3 + $0x1], 0 }
   0x2   :  { %10 = vsyncpa [#allocation5], 0 }
   0x3   :  { %12 = vsyncpa [#allocation5 + $0x1], 0  ;;  %s1056_s9 = smov 0   ;;  %s1058_s10 = smov 0  }
   0x4   :  { %s1060_s11 = smov 0   ;;  %s1062_s12 = smov 0  }
   0x5   :  { %s1064_s13 = smov 0   ;;  %s1066_s14 = smov 0  }
   0x6 LB: > { %s814_s15 = sadd.s32 4294967295, %s1035_s14   ;;  %s30_s16 = sadd.s32 1, %s1031_s13  ;;  %s1035_s14 = sphi %s1066_s14, %s18_s14   ;;  %s1031_s13 = sphi %s1064_s13, %s1434_s13   ;;  %s1027_s12 = sphi %s1062_s12, %s1433_s12   ;;  %s1023_s11 = sphi %s1060_s11, %s1432_s11   ;;  %s1019_s10 = sphi %s1058_s10, %s1431_s10   ;;  %s1015_s9 = sphi %s1056_s9, %s1430_s9  }
   0x7   : > { %p32_p0 = scmp.ge.s32.totalorder %s30_s16, 2  ;;  %s39_s17 = sadd.s32 1, %s1023_s11 }
   0x8   : > { %p46_p1 = scmp.ne.s32.totalorder %s1023_s11, %s1019_s10  ;;  %p47_p2 = scmp.eq.s32.totalorder %s1035_s14, 0 }
   0x9   : > { %s1436_s16 = smov (%p32_p0, %s30_s16), 0  ;;  %p52_p4 = scmp.ne.s32.totalorder %s1019_s10, %s1015_s9 }
   0xa   : > { %p1092_p3 = por %p47_p2, %p46_p1  ;;  %s34_s19 = ssub.s32 %s1031_s13, %s1436_s16 }
   0xb   : > { %p53_p5 = scmp.eq.s32.totalorder %s814_s15, 0  ;;  %p37_p6 = scmp.eq.s32.totalorder %s34_s19, 0 }
   0xc   : > { %p842_p8 = scmp.lt.s32.totalorder %s1035_s14, 2  ;;  %s1108_s22 = sand.u32 1, %s1023_s11  }
   0xd   : > { %p1099_p7 = por %p53_p5, %p52_p4  ;;  %s829_s23 = sshll.u32 %s1031_s13, 12 }
   0xe   : > { %s1105_s21 = scalar_select %p37_p6, %s1023_s11, %s39_s17  }
   0xf   : > { %s818_s24 = sshll.u32 %s1108_s22, 8  ;;  %s144_s27 = scalar_lea.hbm %s1423_s0, %s829_s23 }
  0x10   : > { %s136_s28 = scalar_lea.vmem [#allocation2], %s818_s24  ;;  %p1117_p9 = pnand %p842_p8, %p1092_p3 }
  0x11   : > { %s145_s29 = sshll.u32 %s136_s28, 4  ;;  %s133_s3 = scalar_lea.sflag [#allocation3], %s1108_s22  ;;  %s146_s29 = int_to_ptr.vmem [resolvable:$true] %s145_s29 }
  0x12   : > { %p927_p10 = pneg %p1117_p9  ;;  %s938_s4 = scalar_lea.vmem %s146_s29, 4096 }
  0x13   : > { %p939_p11 = scmp.ne.s32.totalorder %s146_s29, %s938_s4  ;;  %s1037_s5 = smov [#allocation2]  }
  0x14   : > { %s943_s6 = sshll.u32 %s1037_s5, 4  ;;  %s944_s6 = int_to_ptr.vmem [resolvable:$false] %s943_s6 }
  0x15   : > { %p941_p12 = pnand %p939_p11, %p927_p10  ;;  %s945_s7 = scalar_lea.vmem %s944_s6, 8192 }
  0x16   : > { %p946_p0 = scmp.lt.s32.totalorder %s146_s29, %s944_s6  ;;  %p947_p1 = scmp.lt.s32.totalorder %s945_s7, %s938_s4 }
  0x17   : > { %p942_p13 = pneg %p941_p12 }
  0x18   : > { %p948_p2 = por %p947_p1, %p946_p0 }
  0x1a   : > { %p949_p3 = pnand %p948_p2, %p942_p13 }
  0x1c   : > { %952 = shalt.err (!%p949_p3)
}
  0x1d   : > { %s1038_s8 = smov 128   ;;  %s1039_s9 = smov 8  }
  0x1e   : > { %838 = dma.hbm_to_vmem [thread:$0]  (!%p1117_p9), %s144_s27, 4096, %s146_s29, %s133_s3, %s1038_s8, %s1038_s8, %s1039_s9  }
  0x1f   : > { %p823_p4 = scmp.ge.s32.totalorder %s1035_s14, 1  ;;  %p176_p5 = scmp.lt.s32.totalorder %s1035_s14, 3 }
  0x20   : > { %s821_s15 = sshll.u32 %s1108_s22, 6  ;;  %s830_s18 = smul.u32 3072, %s1031_s13 }
  0x21   : > { %p1135_p6 = pnand %p823_p4, %p176_p5  ;;  %s159_s19 = scalar_lea.vmem [#allocation4], %s821_s15 }
  0x22   : > { %s168_s23 = sshll.u32 %s159_s19, 4  ;;  %s167_s26 = scalar_lea.hbm %s1424_s1, %s830_s18  ;;  %s169_s23 = int_to_ptr.vmem [resolvable:$true] %s168_s23 }
  0x23   : > { %s156_s28 = scalar_lea.sflag [#allocation5], %s1108_s22  ;;  %s966_s4 = scalar_lea.vmem %s169_s23, 1024 }
  0x24   : > { %p967_p8 = scmp.ne.s32.totalorder %s169_s23, %s966_s4  ;;  %s1040_s27 = smov [#allocation4]  }
  0x25   : > { %s971_s29 = sshll.u32 %s1040_s27, 4  ;;  %s972_s29 = int_to_ptr.vmem [resolvable:$false] %s971_s29 }
  0x26   : > { %p969_p11 = pnand %p967_p8, %p927_p10  ;;  %s973_s3 = scalar_lea.vmem %s972_s29, 2048 }
  0x27   : > { %p974_p13 = scmp.lt.s32.totalorder %s169_s23, %s972_s29  ;;  %p975_p0 = scmp.lt.s32.totalorder %s973_s3, %s966_s4 }
  0x28   : > { %p970_p12 = pneg %p969_p11 }
  0x29   : > { %p976_p1 = por %p975_p0, %p974_p13 }
  0x2b   : > { %p977_p2 = pnand %p976_p1, %p970_p12 }
  0x2d   : > { %980 = shalt.err (!%p977_p2)
}
  0x2e   : > { %841 = dma.hbm_to_vmem [thread:$0]  (!%p1117_p9), %s167_s26, 1024, %s169_s23, %s156_s28, %s1038_s8, %s1038_s8, %s1039_s9  }
  0x2f   : > { %180 = sbr.rel (%p1135_p6) target bundleno = 579 (0x243), region = 28  ;;  %s182_s22 = sand.u32 (!%p1135_p6), 1, %s1019_s10  }
  0x30   : > { %s824_s5 = sshll.u32 (!%p1135_p6), %s182_s22, 8  ;;  %s183_s6 = scalar_lea.sflag (!%p1135_p6), [#allocation3], %s182_s22 }
  0x31   : > { %s1155_s7 = scalar_lea.vmem (!%p1135_p6), [#allocation2], %s824_s5 }
  0x34   : > { %1006 = dma.done.wait (%p1099_p7), %s183_s6, 4096  }
  0x35   : > { %1008 = vsyncadd (%p1099_p7), %s183_s6, 4294963200  ;;  %s825_s30 = sshll.u32 %s182_s22, 6  ;;  %s192_s15 = scalar_lea.sflag [#allocation5], %s182_s22 }
  0x36   : > { %s195_s18 = scalar_lea.vmem [#allocation4], %s825_s30 }
  0x37   : > { %1010 = dma.done.wait (%p1099_p7), %s192_s15, 1024  }
  0x38   : > { %1012 = vsyncadd (%p1099_p7), %s192_s15, 4294966272  ;;  %vm240_vm0 = vcmask 64512   ;;  %v232_v0 = vld [vmem:[%s195_s18] sm:$0xff]  ;;  %v234_v1 = vld [vmem:[%s195_s18 + $0x10] sm:$0xff]  ;;  %vm532_vm1 = vcmask 130112   ;;  %vm539_vm2 = vcmask 195712  }
  0x39   : > { %v233_v2 = vld [vmem:[%s195_s18 + $0x8] sm:$0xff]  ;;  %v241_v3 = vsel %vm240_vm0, %v232_v0, -inf  ;;  %v247_v4 = vsel %vm240_vm0, %v234_v1, -inf  ;;  %v235_v5 = vld [vmem:[%s195_s18 + $0x18] sm:$0xff]  ;;  %v236_v8 = vld [vmem:[%s195_s18 + $0x20] sm:$0xff]  ;;  %vm546_vm3 = vcmask 261312  }
  0x3a   : > { %242 = vmax.xlane.f32.xlu0 %v241_v3  ;;  %248 = vmax.xlane.f32.xlu1 %v247_v4  ;;  %v244_v6 = vsel %vm240_vm0, %v233_v2, -inf  ;;  %v250_v7 = vsel %vm240_vm0, %v235_v5, -inf  ;;  %v237_v9 = vld [vmem:[%s195_s18 + $0x28] sm:$0xff]  ;;  %v253_v10 = vsel %vm240_vm0, %v236_v8, -inf  ;;  %v238_v12 = vld [vmem:[%s195_s18 + $0x30] sm:$0xff]  ;;  %v239_v13 = vld [vmem:[%s195_s18 + $0x38] sm:$0xff] }
  0x3b   : > { %v256_v11 = vsel %vm240_vm0, %v237_v9, -inf  ;;  %v259_v14 = vsel %vm240_vm0, %v238_v12, -inf  ;;  %v262_v15 = vsel %vm240_vm0, %v239_v13, -inf  ;;  %v329_v61 = vld [vmem:[%s1155_s7] sm:$0xff]  ;;  %vm553_vm4 = vcmask 326912   ;;  %p225_p7 = scmp.lt.s32.totalorder %s1027_s12, 1 }
  0x3c   : > { %v337_v63 = vld [vmem:[%s1155_s7 + $0x40] sm:$0xff]  ;;  %vm560_vm5 = vcmask 392512   ;;  %vm567_vm6 = vcmask 458112   ;;  %vm574_vm7 = vcmask 523712   ;;  %vm693_vm8 = vcmask 1041409  }
  0x3d   : > { %s1438_s12 = smov (!%p225_p7, %s1027_s12), 1  ;;  %vm695_vm9 = vcmask 1042434   ;;  %vm697_vm10 = vcmask 1043459   ;;  %vm700_vm11 = vcmask 519168  }
  0x3e   : > { %245 = vmax.xlane.f32.xlu0 %v244_v6  ;;  %251 = vmax.xlane.f32.xlu1 %v250_v7  ;;  %s826_s20 = sshll.u32 %s1438_s12, 2 }
  0x3f   : > { %s231_s17 = scalar_lea.vmem %s1425_s2, %s826_s20 }
  0x42   : > { %254 = vmax.xlane.f32.xlu0 %v253_v10  ;;  %257 = vmax.xlane.f32.xlu1 %v256_v11  ;;  %v331_v10 = vld [vmem:[%s1155_s7 + $0x10] sm:$0xff] }
  0x46   : > { %260 = vmax.xlane.f32.xlu0 %v259_v14  ;;  %263 = vmax.xlane.f32.xlu1 %v262_v15 }
  0xc3   : > { %v243_v16 = vpop.xlane.xlu0 %242  ;;  %v249_v17 = vpop.xlane.xlu1 %248 }
  0xc4   : > { %v265_v18 = vsub.f32 %v232_v0, %v243_v16  ;;  %v267_v19 = vsub.f32 %v234_v1, %v249_v17  ;;  %v345_v16 = vld [vmem:[%s1155_s7 + $0x80] sm:$0xff] }
  0xc6   : > { %v273_v20 = vmul.f32 1.442695, %v265_v18  ;;  %v277_v21 = vmul.f32 1.442695, %v267_v19  ;;  %v339_v18 = vld [vmem:[%s1155_s7 + $0x50] sm:$0xff] }
  0xc7   : > { %v246_v22 = vpop.xlane.xlu0 %245  ;;  %v252_v23 = vpop.xlane.xlu1 %251 }
  0xc8   : > { %893 = vpow2.f32 %v273_v20  ;;  %v266_v24 = vsub.f32 %v233_v2, %v246_v22  ;;  %v268_v25 = vsub.f32 %v235_v5, %v252_v23  ;;  %v330_v2 = vld [vmem:[%s1155_s7 + $0x8] sm:$0xff] }
  0xc9   : > { %895 = vpow2.f32 %v277_v21 }
  0xca   : > { %v275_v26 = vmul.f32 1.442695, %v266_v24  ;;  %v279_v27 = vmul.f32 1.442695, %v268_v25  ;;  %v346_v25 = vld [vmem:[%s1155_s7 + $0x88] sm:$0xff] }
  0xcb   : > { %v255_v28 = vpop.xlane.xlu0 %254  ;;  %v258_v29 = vpop.xlane.xlu1 %257 }
  0xcc   : > { %897 = vpow2.f32 %v275_v26  ;;  %v269_v30 = vsub.f32 %v236_v8, %v255_v28  ;;  %v270_v31 = vsub.f32 %v237_v9, %v258_v29  ;;  %v338_v8 = vld [vmem:[%s1155_s7 + $0x48] sm:$0xff]  ;;  %v332_v26 = vld [vmem:[%s1155_s7 + $0x18] sm:$0xff] }
  0xcd   : > { %899 = vpow2.f32 %v279_v27 }
  0xce   : > { %v281_v32 = vmul.f32 1.442695, %v269_v30  ;;  %v283_v33 = vmul.f32 1.442695, %v270_v31  ;;  %v340_v31 = vld [vmem:[%s1155_s7 + $0x58] sm:$0xff] }
  0xcf   : > { %v261_v34 = vpop.xlane.xlu0 %260  ;;  %v264_v35 = vpop.xlane.xlu1 %263 }
  0xd0   : > { %901 = vpow2.f32 %v281_v32  ;;  %v271_v36 = vsub.f32 %v238_v12, %v261_v34  ;;  %v272_v37 = vsub.f32 %v239_v13, %v264_v35  ;;  %v347_v32 = vld [vmem:[%s1155_s7 + $0x90] sm:$0xff] }
  0xd1   : > { %903 = vpow2.f32 %v283_v33 }
  0xd2   : > { %v285_v38 = vmul.f32 1.442695, %v271_v36  ;;  %v287_v39 = vmul.f32 1.442695, %v272_v37 }
  0xd4   : > { %905 = vpow2.f32 %v285_v38 }
  0xd5   : > { %v894_v40 = vpop.eup %893  ;;  %907 = vpow2.f32 %v287_v39  ;;  %v353_v39 = vld [vmem:[%s1155_s7 + $0xc0] sm:$0xff] }
  0xd6   : > { %v896_v41 = vpop.eup %895  ;;  %v289_v42 = vsel %vm240_vm0, %v894_v40, 0.0 }
  0xd7   : > { %290 = vadd.xlane.f32.xlu0 %v289_v42  ;;  %v295_v43 = vsel %vm240_vm0, %v896_v41, 0.0 }
  0xd9   : > { %v898_v44 = vpop.eup %897 }
  0xda   : > { %v900_v45 = vpop.eup %899  ;;  %v292_v46 = vsel %vm240_vm0, %v898_v44, 0.0 }
  0xdb   : > { %296 = vadd.xlane.f32.xlu0 %v295_v43  ;;  %293 = vadd.xlane.f32.xlu1 %v292_v46  ;;  %v298_v47 = vsel %vm240_vm0, %v900_v45, 0.0  ;;  %v341_v46 = vld [vmem:[%s1155_s7 + $0x60] sm:$0xff] }
  0xdd   : > { %v1177_v48 = vpop.eup %901 }
  0xde   : > { %v1179_v49 = vpop.eup %903  ;;  %v301_v50 = vsel %vm240_vm0, %v1177_v48, 0.0 }
  0xdf   : > { %299 = vadd.xlane.f32.xlu1 %v298_v47  ;;  %302 = vadd.xlane.f32.xlu0 %v301_v50  ;;  %v304_v51 = vsel %vm240_vm0, %v1179_v49, 0.0  ;;  %v333_v47 = vld [vmem:[%s1155_s7 + $0x20] sm:$0xff] }
  0xe1   : > { %v1185_v52 = vpop.eup %905 }
  0xe2   : > { %v1187_v53 = vpop.eup %907  ;;  %v307_v54 = vsel %vm240_vm0, %v1185_v52, 0.0 }
  0xe3   : > { %305 = vadd.xlane.f32.xlu1 %v304_v51  ;;  %308 = vadd.xlane.f32.xlu0 %v307_v54  ;;  %v310_v55 = vsel %vm240_vm0, %v1187_v53, 0.0 }
  0xe7   : > { %311 = vadd.xlane.f32.xlu1 %v310_v55 }
 0x160   : > { %v291_v56 = vpop.xlane.xlu0 %290 }
 0x161   : > { %909 = vrcp.f32 %v291_v56 }
 0x164   : > { %v294_v57 = vpop.xlane.xlu1 %293  ;;  %v297_v58 = vpop.xlane.xlu0 %296 }
 0x165   : > { %911 = vrcp.f32 %v294_v57 }
 0x166   : > { %913 = vrcp.f32 %v297_v58  ;;  %v355_v58 = vld [vmem:[%s1155_s7 + $0xd0] sm:$0xff] }
 0x168   : > { %v300_v59 = vpop.xlane.xlu1 %299  ;;  %v303_v4 = vpop.xlane.xlu0 %302 }
 0x169   : > { %915 = vrcp.f32 %v300_v59  ;;  %v348_v59 = vld [vmem:[%s1155_s7 + $0x98] sm:$0xff] }
 0x16a   : > { %917 = vrcp.f32 %v303_v4 }
 0x16c   : > { %v306_v20 = vpop.xlane.xlu1 %305  ;;  %v309_v34 = vpop.xlane.xlu0 %308 }
 0x16d   : > { %919 = vrcp.f32 %v306_v20  ;;  %v357_v20 = vld [vmem:[%s1155_s7 + $0xe0] sm:$0xff] }
 0x16e   : > { %v910_v60 = vpop.eup %909  ;;  %921 = vrcp.f32 %v309_v34 }
 0x16f   : > { %v321_v62 = vmul.f32 %v910_v60, %v894_v40  ;;  %v354_v40 = vld [vmem:[%s1155_s7 + $0xc8] sm:$0xff] }
 0x170   : > { %v312_v51 = vpop.xlane.xlu1 %311 }
 0x171   : > { %v361_v0 = vmul.f32 %v329_v61, %v321_v62  ;;  %v369_v7 = vmul.f32 %v337_v63, %v321_v62  ;;  %v377_v19 = vmul.f32 %v345_v16, %v321_v62  ;;  %923 = vrcp.f32 %v312_v51 }
 0x172   : > { %v912_v1 = vpop.eup %911 }
 0x173   : > { %v914_v3 = vpop.eup %913  ;;  %v393_v5 = vsel %vm240_vm0, %v361_v0, 0.0  ;;  %v322_v6 = vmul.f32 %v912_v1, %v898_v44  ;;  %v417_v13 = vsel %vm240_vm0, %v369_v7, 0.0  ;;  %v441_v28 = vsel %vm240_vm0, %v377_v19, 0.0  ;;  %v342_v0 = vld [vmem:[%s1155_s7 + $0x68] sm:$0xff]  ;;  %v356_v7 = vld [vmem:[%s1155_s7 + $0xd8] sm:$0xff] }
 0x174   : > { %394 = vadd.xlane.f32.xlu0 %v393_v5  ;;  %v1198_v9 = vmul.f32 %v914_v3, %v896_v41  ;;  %v385_v41 = vmul.f32 %v353_v39, %v321_v62  ;;  %v334_v1 = vld [vmem:[%s1155_s7 + $0x28] sm:$0xff] }
 0x175   : > { %v362_v11 = vmul.f32 %v330_v2, %v322_v6  ;;  %v370_v14 = vmul.f32 %v338_v8, %v322_v6  ;;  %v378_v29 = vmul.f32 %v346_v25, %v322_v6  ;;  %v386_v44 = vmul.f32 %v354_v40, %v322_v6  ;;  %v349_v8 = vld [vmem:[%s1155_s7 + $0xa0] sm:$0xff] }
 0x176   : > { %v363_v15 = vmul.f32 %v331_v10, %v1198_v9  ;;  %v916_v17 = vpop.eup %915  ;;  %v371_v23 = vmul.f32 %v339_v18, %v1198_v9  ;;  %v379_v38 = vmul.f32 %v347_v32, %v1198_v9  ;;  %v465_v54 = vsel %vm240_vm0, %v385_v41, 0.0  ;;  %v358_v32 = vld [vmem:[%s1155_s7 + $0xe8] sm:$0xff] }
 0x177   : > { %v396_v12 = vsel %vm240_vm0, %v362_v11, 0.0  ;;  %v420_v21 = vsel %vm240_vm0, %v370_v14, 0.0  ;;  %v1209_v24 = vmul.f32 %v916_v17, %v900_v45  ;;  %v918_v33 = vpop.eup %917  ;;  %v444_v35 = vsel %vm240_vm0, %v378_v29, 0.0  ;;  %v335_v14 = vld [vmem:[%s1155_s7 + $0x30] sm:$0xff] }
 0x178   : > { %397 = vadd.xlane.f32.xlu1 %v396_v12  ;;  %418 = vadd.xlane.f32.xlu0 %v417_v13  ;;  %v399_v22 = vsel %vm240_vm0, %v363_v15, 0.0  ;;  %v423_v27 = vsel %vm240_vm0, %v371_v23, 0.0  ;;  %v447_v43 = vsel %vm240_vm0, %v379_v38, 0.0  ;;  %v325_v45 = vmul.f32 %v918_v33, %v1177_v48  ;;  %v343_v13 = vld [vmem:[%s1155_s7 + $0x70] sm:$0xff]  ;;  %v352_v38 = vld [vmem:[%s1155_s7 + $0xb8] sm:$0xff] }
 0x179   : > { %v364_v30 = vmul.f32 %v332_v26, %v1209_v24  ;;  %v372_v37 = vmul.f32 %v340_v31, %v1209_v24  ;;  %v468_v55 = vsel %vm240_vm0, %v386_v44, 0.0  ;;  %v387_v48 = vmul.f32 %v355_v58, %v1198_v9  ;;  %v344_v26 = vld [vmem:[%s1155_s7 + $0x78] sm:$0xff]  ;;  %v351_v33 = vld [vmem:[%s1155_s7 + $0xb0] sm:$0xff] }
 0x17a   : > { %v920_v50 = vpop.eup %919  ;;  %v373_v56 = vmul.f32 %v341_v46, %v325_v45  ;;  %v365_v57 = vmul.f32 %v333_v47, %v325_v45  ;;  %v380_v62 = vmul.f32 %v348_v59, %v1209_v24  ;;  %v381_v11 = vmul.f32 %v349_v8, %v325_v45 }
 0x17b   : > { %v402_v36 = vsel %vm240_vm0, %v364_v30, 0.0  ;;  %v426_v42 = vsel %vm240_vm0, %v372_v37, 0.0  ;;  %v326_v63 = vmul.f32 %v920_v50, %v1179_v49  ;;  %v922_v2 = vpop.eup %921  ;;  %v471_v3 = vsel %vm240_vm0, %v387_v48, 0.0  ;;  %v359_v37 = vld [vmem:[%s1155_s7 + $0xf0] sm:$0xff] }
 0x17c   : > { %421 = vadd.xlane.f32.xlu1 %v420_v21  ;;  %400 = vadd.xlane.f32.xlu0 %v399_v22  ;;  %v429_v60 = vsel %vm240_vm0, %v373_v56, 0.0  ;;  %v405_v61 = vsel %vm240_vm0, %v365_v57, 0.0  ;;  %v450_v4 = vsel %vm240_vm0, %v380_v62, 0.0  ;;  %v388_v49 = vmul.f32 %v356_v7, %v1209_v24  ;;  %v350_v21 = vld [vmem:[%s1155_s7 + $0xa8] sm:$0xff] }
 0x17d   : > { %v374_v5 = vmul.f32 %v342_v0, %v326_v63  ;;  %v366_v6 = vmul.f32 %v334_v1, %v326_v63  ;;  %v327_v12 = vmul.f32 %v922_v2, %v1185_v52  ;;  %v453_v17 = vsel %vm240_vm0, %v381_v11, 0.0 }
 0x17e   : > { %v924_v15 = vpop.eup %923  ;;  %v474_v16 = vsel %vm240_vm0, %v388_v49, 0.0  ;;  %v389_v22 = vmul.f32 %v357_v20, %v325_v45  ;;  %v382_v24 = vmul.f32 %v350_v21, %v326_v63 }
 0x17f   : > { %v432_v9 = vsel %vm240_vm0, %v374_v5, 0.0  ;;  %v408_v10 = vsel %vm240_vm0, %v366_v6, 0.0  ;;  %v375_v18 = vmul.f32 %v343_v13, %v327_v12  ;;  %v367_v19 = vmul.f32 %v335_v14, %v327_v12 }
 0x180   : > { %424 = vadd.xlane.f32.xlu1 %v423_v27  ;;  %442 = vadd.xlane.f32.xlu0 %v441_v28  ;;  %v328_v25 = vmul.f32 %v924_v15, %v1187_v53  ;;  %v336_v27 = vld [vmem:[%s1155_s7 + $0x38] sm:$0xff]  ;;  %v477_v28 = vsel %vm240_vm0, %v389_v22, 0.0  ;;  %v456_v29 = vsel %vm240_vm0, %v382_v24, 0.0  ;;  %v391_v41 = vmul.f32 %v359_v37, %v327_v12 }
 0x181   : > { %v435_v52 = vsel %vm240_vm0, %v375_v18, 0.0  ;;  %v411_v23 = vsel %vm240_vm0, %v367_v19, 0.0 }
 0x182   : > { %v376_v30 = vmul.f32 %v344_v26, %v328_v25  ;;  %v368_v31 = vmul.f32 %v336_v27, %v328_v25  ;;  %v483_v44 = vsel %vm240_vm0, %v391_v41, 0.0 }
 0x184   : > { %445 = vadd.xlane.f32.xlu1 %v444_v35  ;;  %403 = vadd.xlane.f32.xlu0 %v402_v36  ;;  %v438_v34 = vsel %vm240_vm0, %v376_v30, 0.0  ;;  %v414_v53 = vsel %vm240_vm0, %v368_v31, 0.0  ;;  %v390_v35 = vmul.f32 %v358_v32, %v326_v63  ;;  %v383_v36 = vmul.f32 %v351_v33, %v327_v12 }
 0x186   : > { %v480_v39 = vsel %vm240_vm0, %v390_v35, 0.0  ;;  %v459_v40 = vsel %vm240_vm0, %v383_v36, 0.0 }
 0x188   : > { %427 = vadd.xlane.f32.xlu1 %v426_v42  ;;  %448 = vadd.xlane.f32.xlu0 %v447_v43  ;;  %v384_v42 = vmul.f32 %v352_v38, %v328_v25  ;;  %v360_v43 = vld [vmem:[%s1155_s7 + $0xf8] sm:$0xff] }
 0x189   : > { %v392_v46 = vmul.f32 %v360_v43, %v328_v25 }
 0x18a   : > { %v462_v45 = vsel %vm240_vm0, %v384_v42, 0.0 }
 0x18b   : > { %v486_v47 = vsel %vm240_vm0, %v392_v46, 0.0 }
 0x18c   : > { %466 = vadd.xlane.f32.xlu1 %v465_v54  ;;  %469 = vadd.xlane.f32.xlu0 %v468_v55 }
 0x190   : > { %430 = vadd.xlane.f32.xlu0 %v429_v60  ;;  %406 = vadd.xlane.f32.xlu1 %v405_v61 }
 0x194   : > { %472 = vadd.xlane.f32.xlu0 %v471_v3  ;;  %451 = vadd.xlane.f32.xlu1 %v450_v4  ;;  %v521_v4 = vlaneseq }
 0x196   : > { %v522_v7 = vand.u32 127, %v521_v4 }
 0x198   : > { %433 = vadd.xlane.f32.xlu0 %v432_v9  ;;  %409 = vadd.xlane.f32.xlu1 %v408_v10  ;;  %v527_v8 = vadd.s32 4294967288, %v522_v7  ;;  %v524_v10 = vshrl.u32 %v521_v4, 7  ;;  %v534_v11 = vadd.s32 4294967280, %v522_v7  ;;  %v541_v12 = vadd.s32 4294967272, %v522_v7 }
 0x199   : > { %v562_v21 = vadd.s32 4294967248, %v522_v7  ;;  %v569_v27 = vadd.s32 4294967240, %v522_v7 }
 0x19a   : > { %v530_v13 = vsub.s32 %v527_v8, %v524_v10  ;;  %v525_v18 = vsub.s32 %v522_v7, %v524_v10  ;;  %v1311_v19 = vsub.s32 %v534_v11, %v524_v10  ;;  %v1313_v20 = vsub.s32 %v541_v12, %v524_v10 }
 0x19c   : > { %475 = vadd.xlane.f32.xlu0 %v474_v16  ;;  %454 = vadd.xlane.f32.xlu1 %v453_v17  ;;  %v548_v16 = vadd.s32 4294967264, %v522_v7  ;;  %v555_v17 = vadd.s32 4294967256, %v522_v7 }
 0x19e   : > { %v1319_v25 = vsub.s32 %v548_v16, %v524_v10  ;;  %v1321_v26 = vsub.s32 %v555_v17, %v524_v10 }
 0x1a0   : > { %436 = vadd.xlane.f32.xlu0 %v435_v52  ;;  %412 = vadd.xlane.f32.xlu1 %v411_v23 }
 0x1a4   : > { %478 = vadd.xlane.f32.xlu0 %v477_v28  ;;  %457 = vadd.xlane.f32.xlu1 %v456_v29 }
 0x1a8   : > { %439 = vadd.xlane.f32.xlu0 %v438_v34  ;;  %415 = vadd.xlane.f32.xlu1 %v414_v53  ;;  %v1332_v53 = vsub.s32 %v562_v21, %v524_v10 }
 0x1ac   : > { %481 = vadd.xlane.f32.xlu0 %v480_v39  ;;  %460 = vadd.xlane.f32.xlu1 %v459_v40 }
 0x1b0   : > { %484 = vadd.xlane.f32.xlu0 %v483_v44  ;;  %463 = vadd.xlane.f32.xlu1 %v462_v45 }
 0x1b4   : > { %487 = vadd.xlane.f32.xlu1 %v486_v47  ;;  %v572_v47 = vsub.s32 %v569_v27, %v524_v10 }
 0x1fd   : > { %v395_v50 = vpop.xlane.xlu0 %394 }
 0x1fe   : > { %v526_v28 = vrot.slane %v395_v50, %v525_v18 }
 0x201   : > { %v398_v51 = vpop.xlane.xlu1 %397  ;;  %v419_v54 = vpop.xlane.xlu0 %418 }
 0x202   : > { %v531_v22 = vrot.slane %v398_v51, %v530_v13  ;;  %v579_v29 = vrot.slane %v419_v54, %v525_v18 }
 0x204   : > { %v533_v35 = vsel %vm532_vm1, %v531_v22, %v526_v28 }
 0x205   : > { %v422_v55 = vpop.xlane.xlu1 %421  ;;  %v1273_v56 = vpop.xlane.xlu0 %400 }
 0x206   : > { %v583_v52 = vrot.slane %v422_v55, %v530_v13  ;;  %v538_v30 = vrot.slane %v1273_v56, %v1311_v19 }
 0x208   : > { %v584_v36 = vsel %vm532_vm1, %v583_v52, %v579_v29  ;;  %v540_v44 = vsel %vm539_vm2, %v538_v30, %v533_v35 }
 0x209   : > { %v1275_v57 = vpop.xlane.xlu1 %424  ;;  %v1277_v58 = vpop.xlane.xlu0 %442 }
 0x20a   : > { %v588_v31 = vrot.slane %v1275_v57, %v1311_v19  ;;  %v618_v40 = vrot.slane %v1277_v58, %v525_v18 }
 0x20c   : > { %v589_v45 = vsel %vm539_vm2, %v588_v31, %v584_v36 }
 0x20d   : > { %v1279_v59 = vpop.xlane.xlu1 %445  ;;  %v1281_v48 = vpop.xlane.xlu0 %403 }
 0x20e   : > { %v622_v32 = vrot.slane %v1279_v59, %v530_v13  ;;  %v545_v33 = vrot.slane %v1281_v48, %v1313_v20 }
 0x210   : > { %v623_v50 = vsel %vm532_vm1, %v622_v32, %v618_v40  ;;  %v547_v51 = vsel %vm546_vm3, %v545_v33, %v540_v44 }
 0x211   : > { %v1283_v60 = vpop.xlane.xlu1 %427  ;;  %v1285_v61 = vpop.xlane.xlu0 %448 }
 0x212   : > { %v593_v34 = vrot.slane %v1283_v60, %v1313_v20  ;;  %v627_v37 = vrot.slane %v1285_v61, %v1311_v19 }
 0x214   : > { %v594_v54 = vsel %vm546_vm3, %v593_v34, %v589_v45  ;;  %v628_v55 = vsel %vm539_vm2, %v627_v37, %v623_v50 }
 0x215   : > { %v1287_v62 = vpop.xlane.xlu1 %466  ;;  %v1289_v63 = vpop.xlane.xlu0 %469 }
 0x216   : > { %v657_v41 = vrot.slane %v1287_v62, %v525_v18  ;;  %v661_v42 = vrot.slane %v1289_v63, %v530_v13 }
 0x218   : > { %v662_v60 = vsel %vm532_vm1, %v661_v42, %v657_v41 }
 0x219   : > { %v1291_v0 = vpop.xlane.xlu1 %406  ;;  %v1293_v1 = vpop.xlane.xlu0 %430 }
 0x21a   : > { %v552_v43 = vrot.slane %v1291_v0, %v1319_v25  ;;  %v598_v46 = vrot.slane %v1293_v1, %v1319_v25 }
 0x21c   : > { %v554_v61 = vsel %vm553_vm4, %v552_v43, %v547_v51  ;;  %v599_v0 = vsel %vm553_vm4, %v598_v46, %v594_v54 }
 0x21d   : > { %v1295_v2 = vpop.xlane.xlu1 %451  ;;  %v1297_v3 = vpop.xlane.xlu0 %472 }
 0x21e   : > { %v632_v56 = vrot.slane %v1295_v2, %v1313_v20  ;;  %v666_v57 = vrot.slane %v1297_v3, %v1311_v19 }
 0x220   : > { %v633_v8 = vsel %vm546_vm3, %v632_v56, %v628_v55 }
 0x221   : > { %v1299_v5 = vpop.xlane.xlu1 %409  ;;  %v1301_v6 = vpop.xlane.xlu0 %433 }
 0x222   : > { %v559_v58 = vrot.slane %v1299_v5, %v1321_v26  ;;  %v603_v62 = vrot.slane %v1301_v6, %v1321_v26 }
 0x224   : > { %v561_v10 = vsel %vm560_vm5, %v559_v58, %v554_v61 }
 0x225   : > { %v1303_v49 = vpop.xlane.xlu1 %454  ;;  %v1305_v9 = vpop.xlane.xlu0 %475 }
 0x226   : > { %v637_v63 = vrot.slane %v1303_v49, %v1319_v25  ;;  %v671_v4 = vrot.slane %v1305_v9, %v1313_v20  ;;  %v667_v49 = vsel %vm539_vm2, %v666_v57, %v662_v60  ;;  %v604_v9 = vsel %vm560_vm5, %v603_v62, %v599_v0 }
 0x228   : > { %v672_v21 = vsel %vm546_vm3, %v671_v4, %v667_v49 }
 0x229   : > { %v1307_v14 = vpop.xlane.xlu1 %412  ;;  %v1309_v15 = vpop.xlane.xlu0 %436 }
 0x22a   : > { %v566_v1 = vrot.slane %v1307_v14, %v1332_v53  ;;  %v608_v2 = vrot.slane %v1309_v15, %v1332_v53  ;;  %v638_v14 = vsel %vm553_vm4, %v637_v63, %v633_v8 }
 0x22c   : > { %v568_v17 = vsel %vm567_vm6, %v566_v1, %v561_v10  ;;  %v609_v18 = vsel %vm567_vm6, %v608_v2, %v604_v9 }
 0x22d   : > { %v1315_v23 = vpop.xlane.xlu1 %457  ;;  %v1317_v24 = vpop.xlane.xlu0 %478 }
 0x22e   : > { %v642_v3 = vrot.slane %v1315_v23, %v1321_v26  ;;  %v676_v11 = vrot.slane %v1317_v24, %v1319_v25 }
 0x230   : > { %v643_v19 = vsel %vm560_vm5, %v642_v3, %v638_v14  ;;  %v677_v24 = vsel %vm553_vm4, %v676_v11, %v672_v21 }
 0x231   : > { %v416_v38 = vpop.xlane.xlu1 %415  ;;  %v440_v39 = vpop.xlane.xlu0 %439 }
 0x232   : > { %v573_v5 = vrot.slane %v416_v38, %v572_v47  ;;  %v613_v7 = vrot.slane %v440_v39, %v572_v47 }
 0x234   : > { %v575_v22 = vsel %vm574_vm7, %v573_v5, %v568_v17  ;;  %v614_v52 = vsel %vm574_vm7, %v613_v7, %v609_v18 }
 0x235   : > { %v461_v59 = vpop.xlane.xlu1 %460  ;;  %v482_v48 = vpop.xlane.xlu0 %481  ;;  %v694_v29 = vsel %vm693_vm8, %v614_v52, %v575_v22 }
 0x236   : > { %v647_v6 = vrot.slane %v461_v59, %v1332_v53  ;;  %v681_v15 = vrot.slane %v482_v48, %v1321_v26 }
 0x238   : > { %v648_v23 = vsel %vm567_vm6, %v647_v6, %v643_v19  ;;  %v682_v27 = vsel %vm560_vm5, %v681_v15, %v677_v24 }
 0x239   : > { %v464_v12 = vpop.xlane.xlu1 %463  ;;  %v485_v13 = vpop.xlane.xlu0 %484 }
 0x23a   : > { %v652_v16 = vrot.slane %v464_v12, %v572_v47  ;;  %v686_v20 = vrot.slane %v485_v13, %v1332_v53 }
 0x23c   : > { %v653_v25 = vsel %vm574_vm7, %v652_v16, %v648_v23  ;;  %v687_v30 = vsel %vm567_vm6, %v686_v20, %v682_v27 }
 0x23d   : > { %v488_v26 = vpop.xlane.xlu1 %487  ;;  %v696_v31 = vsel %vm695_vm9, %v653_v25, %v694_v29 }
 0x23e   : > { %v691_v28 = vrot.slane %v488_v26, %v572_v47 }
 0x240   : > { %v692_v32 = vsel %vm574_vm7, %v691_v28, %v687_v30 }
 0x241   : > { %v698_v33 = vsel %vm697_vm10, %v692_v32, %v696_v31 }
 0x242   : > { %701 = vst.msk [vmem:[%s231_s17] sm:$0xf] %vm700_vm11, %v698_v33 }
 0x243 PF: > { %s18_s14 = sadd.s32 1, %s1035_s14   ;;  %s1430_s9 = smov %s1019_s10 }
 0x244   : > { %p15_p9 = scmp.ge.s32.totalorder %s18_s14, 4   ;;  %s1431_s10 = smov %s1023_s11 }
 0x245   : > { %s1432_s11 = smov %s1105_s21  ;;  %s1433_s12 = smov %s1031_s13 }
 0x246   : > { %s1434_s13 = smov %s1436_s16  ;;  %17 = sbr.rel (!%p15_p9) target bundleno = 6 (0x6), region = 81 }
 0x24b   :  { %727 = vsyncpa [#allocation3], 1 }
 0x24c   :  { %729 = vsyncpa [#allocation3 + $0x1], 1 }
 0x24d   :  { %730 = vsyncpa [#allocation5], 1 }
 0x24e   :  { %732 = vsyncpa [#allocation5 + $0x1], 1 }

</bundles_post_ra>
